<compile_context>
chip_gen: v7x
topology: tpu7x:2x2x1
jax: 0.10.0
libtpu: 0.0.40
codegen_flags: <defaults>
</compile_context>

<pallas_src>
import functools

import jax
import jax.numpy as jnp
from jax.experimental import pallas as pl
from jax.experimental.pallas import tpu as pltpu

_LANE = 128
_SUBLANE = 8


def _round_up(n, m):
    return ((n + m - 1) // m) * m


def _fused_mlp_kernel(out_dim, *refs):
    """refs = (x_ref, w0_ref, b0_ref, w1_ref, b1_ref, ..., o_ref).

    h = x; for each layer: h = h @ W_t + b (ReLU between hidden layers).
    Unrolled at trace time; the activation never leaves vregs/VMEM. All
    intermediate matmuls are lane-dense (padded to 128); only the final store
    is (possibly) a single masked vst of width out_dim.
    """
    x_ref, o_ref = refs[0], refs[-1]
    wb_refs = refs[1:-1]
    n_layers = len(wb_refs) // 2

    h = x_ref[...]                                   # f32 (batch_pad, in_pad)
    for i in range(n_layers):
        w = wb_refs[2 * i][...]                      # (in_pad, out_pad) f32/bf16
        b = wb_refs[2 * i + 1][...]                  # (1, out_pad) f32
        # bf16 operands (if param_dtype=bf16) with f32 accumulation on the MXU;
        # bias add + ReLU in f32 on the VPU (v5e has no bf16 VPU path).
        h = jnp.dot(h.astype(w.dtype), w, preferred_element_type=jnp.float32) + b
        if i < n_layers - 1:
            h = jnp.maximum(h, 0.0)                  # fused ReLU
    # Unpadded final store: no XLA slice after the kernel.
    o_ref[...] = h[:, :out_dim].astype(o_ref.dtype)


def prepare_params(params, param_dtype=jnp.float32):
    """One-time parameter preparation (do NOT call per forward).

    params: list of (W, b) in PyTorch layout, W: (out_features, in_features).
    Returns (prepared, out_dim, d_in_pad) where prepared is a flat list
    [w0_t, b0, w1_t, b1, ...] with:
      * weights transposed to (in, out) so the kernel computes x @ W_t + b,
      * every in/out feature dim zero-padded to a multiple of 128 (lane-dense
        loads, K-dense MXU passes, unmasked intermediate stores),
      * weights cast to param_dtype (e.g. bf16 for v6e/v7x MXU), biases kept f32,
      * biases reshaped to (1, out_pad).
    Zero padding is exact: padded x columns / weight rows are zero and padded
    bias entries are zero (ReLU(0)=0), so results match the unpadded network.
    """
    prepared = []
    d_in0 = params[0][0].shape[1]
    d_in_pad = _round_up(d_in0, _LANE)
    prev_out_pad = d_in_pad
    out_dim = None
    for w, b in params:
        o, d_in = w.shape
        out_dim = o
        in_pad = prev_out_pad
        out_pad = _round_up(o, _LANE)

        w_t = jnp.asarray(w, jnp.float32).T.astype(param_dtype)   # (d_in, o)
        w_pad = jnp.zeros((in_pad, out_pad), param_dtype).at[:d_in, :o].set(w_t)
        b_pad = jnp.zeros((1, out_pad), jnp.float32).at[0, :o].set(
            jnp.asarray(b, jnp.float32))

        prepared.append(w_pad)
        prepared.append(b_pad)
        prev_out_pad = out_pad
    return prepared, out_dim, d_in_pad


def _fused_mlp_call(x_pad, prepared, out_dim):
    """Single pallas_call running the entire network, output unpadded."""
    batch_pad, d_in_pad = x_pad.shape
    assert prepared[0].shape[0] == d_in_pad, "padded input dim mismatch"

    vmem = pl.BlockSpec(memory_space=pltpu.MemorySpace.VMEM)
    kernel = functools.partial(_fused_mlp_kernel, out_dim)

    return pl.pallas_call(
        kernel,
        out_shape=jax.ShapeDtypeStruct((batch_pad, out_dim), jnp.float32),
        in_specs=[vmem] * (1 + len(prepared)),
        out_specs=vmem,
    )(x_pad, *prepared)


def make_forward(params, linear=True, param_dtype=jnp.float32):
    """Builds a jitted forward fn replicating Base.forward.

    params: list of (W, b) in PyTorch layout (out_features, in_features).
    linear=True  -> exactly 1 layer, no activation.
    linear=False -> ReLU after every layer except the last.
    param_dtype  -> dtype weights are stored/fed to the MXU in (f32 default;
                    bf16 recommended on v6e/v7x when tolerance allows).
    """
    if linear:
        assert len(params) == 1, "linear=True implies a single nn.Linear"
    prepared, out_dim, d_in_pad = prepare_params(params, param_dtype)
    d_in = params[0][0].shape[1]

    @jax.jit
    def forward(x):
        batch, xd = x.shape
        assert xd == d_in, "input feature dim mismatch"
        batch_pad = _round_up(batch, _SUBLANE)
        if batch_pad != batch or d_in_pad != d_in:
            # Zero-pad once (lane-dense x load, K-dense first matmul); exact.
            x_p = jnp.zeros((batch_pad, d_in_pad), jnp.float32).at[:batch, :d_in].set(
                x.astype(jnp.float32))
        else:
            x_p = x.astype(jnp.float32)
        y = _fused_mlp_call(x_p, prepared, out_dim)
        if batch_pad != batch:
            y = y[:batch]
        return y

    return forward


def _init_linear_params(key, in_dim, out_dim):
    """Deterministic init mimicking nn.Linear default (uniform +-1/sqrt(in_dim))."""
    kw, kb = jax.random.split(key)
    bound = 1.0 / jnp.sqrt(jnp.float32(in_dim))
    w = jax.random.uniform(kw, (out_dim, in_dim), jnp.float32, -bound, bound)
    b = jax.random.uniform(kb, (out_dim,), jnp.float32, -bound, bound)
    return w, b


if __name__ == "__main__":
    key = jax.random.PRNGKey(0)

    batch = 8
    input_dim = 32
    target_dim = 4
    embed_dim = [32]  # one hidden layer for the nonlinear (MLP) variant

    kx, k1, k2, k3 = jax.random.split(key, 4)
    x = jax.random.normal(kx, (batch, input_dim), jnp.float32)

    # --- linear=True: Base.model = nn.Linear(input_dim, target_dim) ---
    lin_params = [_init_linear_params(k1, input_dim, target_dim)]
    lin_forward = make_forward(lin_params, linear=True)
    y_lin = jax.block_until_ready(lin_forward(x))

    w0, b0 = lin_params[0]
    ref_lin = x @ w0.T + b0
    assert y_lin.shape == (batch, target_dim)
    assert jnp.allclose(y_lin, ref_lin, atol=1e-5), "linear path mismatch"

    # --- linear=False: Linear(input_dim, embed) -> ReLU -> Linear(embed, target) ---
    dims = [input_dim] + embed_dim + [target_dim]
    keys = [k2, k3]
    mlp_params = [
        _init_linear_params(keys[i], dims[i], dims[i + 1]) for i in range(len(dims) - 1)
    ]
    mlp_forward = make_forward(mlp_params, linear=False)
    y_mlp = jax.block_until_ready(mlp_forward(x))

    h = x
    for i, (w, b) in enumerate(mlp_params):
        h = h @ w.T + b
        if i < len(mlp_params) - 1:
            h = jnp.maximum(h, 0.0)
    assert y_mlp.shape == (batch, target_dim)
    assert jnp.allclose(y_mlp, h, atol=1e-5), "MLP path mismatch"

    # --- bf16-operand variant (v6e/v7x MXU path), f32 accumulation ---
    mlp_forward_bf16 = make_forward(mlp_params, linear=False, param_dtype=jnp.bfloat16)
    y_mlp_bf16 = jax.block_until_ready(mlp_forward_bf16(x))
    assert y_mlp_bf16.shape == (batch, target_dim)
    assert jnp.allclose(y_mlp_bf16, h, atol=1e-1), "bf16 MLP path mismatch"

    print("KERNEL_OK")
</pallas_src>

<mosaic_0001>
module attributes {stable_mosaic.version = 11 : i64} {
  func.func @_fused_mlp_kernel(%arg0: memref<8x128xf32, #tpu.memory_space<vmem>>, %arg1: memref<128x128xf32, #tpu.memory_space<vmem>>, %arg2: memref<1x128xf32, #tpu.memory_space<vmem>>, %arg3: memref<8x4xf32, #tpu.memory_space<vmem>>) attributes {dimension_semantics = [], scalar_prefetch = 0 : i64, scratch_operands = 0 : i64, tpu.core_type = #tpu.core_type<tc>} {
    %c0 = arith.constant 0 : index
    %c0_0 = arith.constant 0 : index
    %0 = vector.load %arg0[%c0, %c0_0] : memref<8x128xf32, #tpu.memory_space<vmem>>, vector<8x128xf32>
    %c0_1 = arith.constant 0 : index
    %c0_2 = arith.constant 0 : index
    %1 = vector.load %arg1[%c0_1, %c0_2] : memref<128x128xf32, #tpu.memory_space<vmem>>, vector<128x128xf32>
    %c0_3 = arith.constant 0 : index
    %c0_4 = arith.constant 0 : index
    %2 = vector.load %arg2[%c0_3, %c0_4] : memref<1x128xf32, #tpu.memory_space<vmem>>, vector<1x128xf32>
    %cst = arith.constant dense<0.000000e+00> : vector<8x128xf32>
    %3 = tpu.matmul %0, %1, %cst {dimension_numbers = #tpu.dot_dimension_numbers<[1], [0], [0], [1], [0, 0, 1, 1], [], []>} : vector<8x128xf32>, vector<128x128xf32>, vector<8x128xf32> -> vector<8x128xf32>
    %4 = vector.broadcast %2 : vector<1x128xf32> to vector<8x128xf32>
    %5 = arith.addf %3, %4 : vector<8x128xf32>
    %6 = vector.extract_strided_slice %5 {offsets = [0, 0], sizes = [8, 4], strides = [1, 1]} : vector<8x128xf32> to vector<8x4xf32>
    %c0_5 = arith.constant 0 : index
    %c0_6 = arith.constant 0 : index
    %7 = vector.load %arg3[%c0_5, %c0_6] : memref<8x4xf32, #tpu.memory_space<vmem>>, vector<8x4xf32>
    tpu.vector_store %arg3[%c0_5, %c0_6], %6 {strides = array<i32>} : memref<8x4xf32, #tpu.memory_space<vmem>>, vector<8x4xf32>,
    return
  }
}

</mosaic_0001>

<bundles_post_ra>
// kernel: forward.1
= control target key start
LH: loop header
LB: loop body
LE: loop exit
PB: predicated region body
PF: predicated region fallthrough
CT: control target
= control target key end

     0   :  { %8 = vsyncpa [#allocation3], 0  ;;  %s236_s12 = smov [#allocation2]   ;;  %s283_s0 = inlined_call_operand.vmem [shape: f32[8,128], index: 0, kind: input, shape index: {}]   ;;  %s284_s1 = inlined_call_operand.hbm [shape: f32[128,128], index: 1, kind: input, shape index: {}]   ;;  %s285_s2 = inlined_call_operand.vmem [shape: f32[1,128], index: 2, kind: input, shape index: {}]   ;;  %s286_s3 = inlined_call_operand.vmem [shape: f32[8,4], index: 3, kind: output, shape index: {}]  }
   0x1   :  { %s16_s13 = sshll.u32 %s236_s12, 4  ;;  %s212_s16 = scalar_lea.hbm %s284_s1, 2048  ;;  %s17_s13 = int_to_ptr.vmem [resolvable:$true] %s16_s13 }
   0x2   :  { %p213_p0 = scmp.ne.s32.totalorder %s284_s1, %s212_s16  ;;  %p216_p1 = scmp.lt.u32.totalorder %s212_s16, %s284_s1 }
   0x4   :  { %p218_p2 = pnand %p216_p1, %p213_p0 }
   0x6   :  { %221 = shalt.err (!%p218_p2)
}
   0x7   :  { %s222_s21 = scalar_lea.vmem %s17_s13, 2048  ;;  %p227_p4 = scmp.lt.s32.totalorder %s17_s13, %s17_s13 }
   0x8   :  { %p223_p3 = scmp.ne.s32.totalorder %s17_s13, %s222_s21  ;;  %p228_p5 = scmp.lt.s32.totalorder %s222_s21, %s222_s21 }
   0xa   :  { %p229_p6 = por %p228_p5, %p227_p4 }
   0xc   :  { %p230_p7 = pnand %p229_p6, %p223_p3 }
   0xe   :  { %233 = shalt.err (!%p230_p7)
}
   0xf   :  { %s237_s22 = smov 128   ;;  %s238_s23 = smov 8  }
  0x10   :  { %22 = dma.hbm_to_vmem [thread:$0]  %s284_s1, 2048, %s17_s13, [#allocation3], %s237_s22, %s237_s22, %s238_s23  }
  0x11   :  { %234 = dma.done.wait [#allocation3], 2048  }
  0x12   :  { %235 = vsyncadd [#allocation3], 4294965248  ;;  %v239_v0 = vmov 0.0|0.0   ;;  %vm240_vm0 = vmmov 0   ;;  %v241_v1 = vmov 0.0   ;;  %v29_v2 = vld [vmem:[#allocation2] sm:$0xff] }
  0x13   :  { %182 = vmatprep.subr.bf16.mxu0 %v239_v0  ;;  %179 = vmatprep.mubr.msk.f32.mxu0 %vm240_vm0, %v241_v1  ;;  %v30_v3 = vld [vmem:[#allocation2 + $0x8] sm:$0xff]  ;;  %v31_v4 = vld [vmem:[#allocation2 + $0x10] sm:$0xff]  ;;  %v32_v6 = vld [vmem:[#allocation2 + $0x18] sm:$0xff]  ;;  %vm122_vm1 = vcmask 31744  }
  0x14   :  { %v183_v5 = vpack.c.bf16 %v30_v3, %v29_v2  ;;  %v186_v7 = vpack.c.bf16 %v32_v6, %v31_v4  ;;  %v33_v8 = vld [vmem:[#allocation2 + $0x20] sm:$0xff]  ;;  %v34_v9 = vld [vmem:[#allocation2 + $0x28] sm:$0xff]  ;;  %v35_v11 = vld [vmem:[#allocation2 + $0x30] sm:$0xff] }
  0x15   :  { %v189_v10 = vpack.c.bf16 %v34_v9, %v33_v8  ;;  %v36_v12 = vld [vmem:[#allocation2 + $0x38] sm:$0xff]  ;;  %v37_v14 = vld [vmem:[#allocation2 + $0x40] sm:$0xff]  ;;  %v38_v15 = vld [vmem:[#allocation2 + $0x48] sm:$0xff] }
  0x16   :  { %184 = vmatpush3.bf16.msra.mxu0 %v183_v5  ;;  %v192_v13 = vpack.c.bf16 %v36_v12, %v35_v11  ;;  %v195_v16 = vpack.c.bf16 %v38_v15, %v37_v14  ;;  %v39_v17 = vld [vmem:[#allocation2 + $0x50] sm:$0xff]  ;;  %v40_v18 = vld [vmem:[#allocation2 + $0x58] sm:$0xff]  ;;  %v41_v20 = vld [vmem:[#allocation2 + $0x60] sm:$0xff] }
  0x17   :  { %185 = vmatprep.subr.bf16.mxu0 %v239_v0  ;;  %v198_v19 = vpack.c.bf16 %v40_v18, %v39_v17  ;;  %v42_v21 = vld [vmem:[#allocation2 + $0x68] sm:$0xff]  ;;  %v43_v23 = vld [vmem:[#allocation2 + $0x70] sm:$0xff]  ;;  %v44_v24 = vld [vmem:[#allocation2 + $0x78] sm:$0xff] }
  0x18   :  { %v201_v22 = vpack.c.bf16 %v42_v21, %v41_v20  ;;  %v204_v25 = vpack.c.bf16 %v44_v24, %v43_v23  ;;  %v28_v26 = vld [vmem:[%s283_s0] sm:$0xff] }
  0x19   :  { %v129_v27 = vld [vmem:[%s285_s2] ss:$0 sm:$0xff] }
  0x1a   :  { %187 = vmatpush3.bf16.msra.mxu0 %v186_v7 }
  0x1b   :  { %188 = vmatprep.subr.bf16.mxu0 %v239_v0 }
  0x1e   :  { %190 = vmatpush3.bf16.msra.mxu0 %v189_v10 }
  0x1f   :  { %191 = vmatprep.subr.bf16.mxu0 %v239_v0 }
  0x22   :  { %193 = vmatpush3.bf16.msra.mxu0 %v192_v13 }
  0x23   :  { %194 = vmatprep.subr.bf16.mxu0 %v239_v0 }
  0x26   :  { %196 = vmatpush3.bf16.msra.mxu0 %v195_v16 }
  0x27   :  { %197 = vmatprep.subr.bf16.mxu0 %v239_v0 }
  0x2a   :  { %199 = vmatpush3.bf16.msra.mxu0 %v198_v19 }
  0x2b   :  { %200 = vmatprep.subr.bf16.mxu0 %v239_v0 }
  0x2e   :  { %202 = vmatpush3.bf16.msra.mxu0 %v201_v22 }
  0x2f   :  { %203 = vmatprep.subr.bf16.mxu0 %v239_v0 }
  0x32   :  { %205 = vmatpush3.bf16.msra.mxu0 %v204_v25 }
  0x35   :  { %180 = vmatmul.mubr.f32.vlgmr.msra.gmra.mrb[0].mxu0 %v28_v26 }
 0x108   :  { %v118_v28 = vpop.f32.mrb[0].mxu0 }
 0x109   :  { %v119_v29 = vadd.f32 %v129_v27, %v118_v28  ;;  %v181_v30 = vpop.f32.mrb[1].mxu0 }
 0x10b   :  { %123 = vst.msk [vmem:[%s286_s3] sm:$0xff] %vm122_vm1, %v119_v29 }
 0x10c   :  { %128 = vsyncpa [#allocation3], 1 }

</bundles_post_ra>
